<compile_context>
chip_gen: v7x
topology: tpu7x:2x2x1
jax: 0.10.0
libtpu: 0.0.40
codegen_flags: <defaults>
</compile_context>

<pallas_src>
import functools

import numpy as np
import jax
import jax.numpy as jnp
from jax.experimental import pallas as pl
from jax.experimental.pallas import tpu as pltpu


_LANE = 128
_SUBLANE = 8


def _round_up(x, m):
    return (x + m - 1) // m * m


def _pad_batch(a, b_pad):
    b = a.shape[0]
    if b == b_pad:
        return a
    return jnp.pad(a, ((0, b_pad - b),) + ((0, 0),) * (a.ndim - 1))


# ----------------------------------------------------------------------------
# Parameter prep (one-time, outside the hot path)
# ----------------------------------------------------------------------------
def prepare_params(weights, biases, d_x, d_z, d_h, output_size,
                   compute_dtype=jnp.bfloat16):
    """weights[i]: (in_i, out_i) f32, biases[i]: (1, out_i) f32 (output last).

    - splits the first-layer weight into x / z / h row blocks (single step
      kernel never needs a concatenated input),
    - builds the packed layer-0 weight `w0zh` of shape (d_out_pad, hidden0)
      whose rows line up with the carried 128-lane output layout
      [omega | h | z-slot | zero pad] used by the fused rollout,
    - zero-pads the output layer to a multiple of 128 columns (lane-dense
      store) while reserving d_z of the zero columns as the z slot,
    - casts matmul operands to `compute_dtype` (bf16); biases stay f32.
    """
    w0 = weights[0]
    assert w0.shape[0] == d_x + d_z + d_h
    w0x = w0[:d_x]
    w0z = w0[d_x:d_x + d_z]
    w0h = w0[d_x + d_z:]
    hidden0 = w0.shape[1]

    w_out, b_out = weights[-1], biases[-1]
    d_out = w_out.shape[1]                      # output_size + d_h
    assert d_out == output_size + d_h
    # pad so the zero columns can also host z (z slot starts at d_out)
    d_out_pad = _round_up(d_out + d_z, _LANE)

    # packed layer-0 weight for the fused rollout
    w0zh = jnp.zeros((d_out_pad, hidden0), jnp.float32)
    w0zh = w0zh.at[output_size:output_size + d_h].set(w0h)
    w0zh = w0zh.at[output_size + d_h:output_size + d_h + d_z].set(w0z)

    w_out_p = jnp.zeros((w_out.shape[0], d_out_pad), jnp.float32).at[:, :d_out].set(w_out)
    b_out_p = jnp.zeros((1, d_out_pad), jnp.float32).at[:, :d_out].set(b_out)

    return dict(
        w0x=w0x.astype(compute_dtype),
        w0z=w0z.astype(compute_dtype),
        w0h=w0h.astype(compute_dtype),
        w0zh=w0zh.astype(compute_dtype),
        b0=biases[0].astype(jnp.float32),
        hidden_ws=[w.astype(compute_dtype) for w in weights[1:-1]],
        hidden_bs=[b.astype(jnp.float32) for b in biases[1:-1]],
        w_out=w_out_p.astype(compute_dtype),
        b_out=b_out_p,
    )


def _flat_weight_list(params):
    flat = [params["w0x"], params["w0z"], params["w0h"], params["b0"]]
    for w, b in zip(params["hidden_ws"], params["hidden_bs"]):
        flat += [w, b]
    flat += [params["w_out"], params["b_out"]]
    return flat


# ----------------------------------------------------------------------------
# Kernels
# ----------------------------------------------------------------------------
def _make_step_kernel(num_hidden_layers):
    """Single step: x, z, h -> lane-dense padded rnn_output (one store)."""

    def kernel(x_ref, z_ref, h_ref, *refs):
        # refs = [w0x, w0z, w0h, b0, (w_i, b_i)..., w_out, b_out, out_ref]
        out_ref = refs[-1]
        w0x, w0z, w0h, b0 = refs[0], refs[1], refs[2], refs[3]
        cdt = w0x.dtype

        # layer 0 as three partial matmuls (no input concat); chained adjacent
        # f32 accumulation keeps the partial-dot chain MRB-fusible on v7x.
        acc = jnp.dot(x_ref[...].astype(cdt), w0x[...],
                      preferred_element_type=jnp.float32)
        acc = acc + jnp.dot(z_ref[...].astype(cdt), w0z[...],
                            preferred_element_type=jnp.float32)
        acc = acc + jnp.dot(h_ref[...].astype(cdt), w0h[...],
                            preferred_element_type=jnp.float32)
        act = jnp.maximum(acc + b0[...], 0.0)

        idx = 4
        for _ in range(num_hidden_layers - 1):
            w, b = refs[idx], refs[idx + 1]
            idx += 2
            act = jnp.maximum(
                jnp.dot(act.astype(cdt), w[...],
                        preferred_element_type=jnp.float32) + b[...], 0.0)

        w_out, b_out = refs[idx], refs[idx + 1]
        out = jnp.dot(act.astype(cdt), w_out[...],
                      preferred_element_type=jnp.float32) + b_out[...]
        out_ref[...] = out          # single unmasked, 128-lane-dense store

    return kernel


def _make_rollout_kernel(num_hidden_layers, T):
    """T fused recurrent steps, loop fully unrolled inside one kernel body.

    The recurrent state is the full 128-lane padded previous output carried as
    a plain loop value (vregs / VMEM, never HBM).  z_t arrives pre-placed in
    the reserved zero lanes of that layout, so layer 0 per step is one VPU add
    + one MXU dot against the packed W0_{z,h}.
    """

    def kernel(x_ref, zpad_ref, hinit_ref, *refs):
        # refs = [w0x, w0zh, b0, (w_i, b_i)..., w_out, b_out, out_ref]
        out_ref = refs[-1]
        wb = refs[:-1]
        cdt = wb[0].dtype

        # hoist all weight / bias loads out of the unrolled loop
        w0x, w0zh, b0 = wb[0][...], wb[1][...], wb[2][...]
        hidden = []
        idx = 3
        for _ in range(num_hidden_layers - 1):
            hidden.append((wb[idx][...], wb[idx + 1][...]))
            idx += 2
        w_out, b_out = wb[idx][...], wb[idx + 1][...]

        # Step-invariant: the AIR image is the same every step -- compute its
        # layer-0 contribution (plus bias, already pre-broadcast) once.
        base = jnp.dot(x_ref[...].astype(cdt), w0x,
                       preferred_element_type=jnp.float32) + b0

        # full 128-lane carry: h at cols [os, os+dh), zeros elsewhere
        out_prev = hinit_ref[...]

        for t in range(T):  # fully unrolled: no per-step grid/DMA overhead
            packed = out_prev + zpad_ref[t]        # z_t lives in the zero lanes
            acc = base + jnp.dot(packed.astype(cdt), w0zh,
                                 preferred_element_type=jnp.float32)
            act = jnp.maximum(acc, 0.0)
            for w, b in hidden:
                act = jnp.maximum(
                    jnp.dot(act.astype(cdt), w,
                            preferred_element_type=jnp.float32) + b, 0.0)
            out_prev = jnp.dot(act.astype(cdt), w_out,
                               preferred_element_type=jnp.float32) + b_out
            out_ref[t] = out_prev                  # lane-dense (btile, 128) store

    return kernel


# ----------------------------------------------------------------------------
# Wrappers
# ----------------------------------------------------------------------------
@functools.partial(jax.jit,
                   static_argnames=("output_size", "hidden_state_dim", "baseline_net"))
def rnn_forward(x, z_im1, h_im1, params, *, output_size, hidden_state_dim,
                baseline_net):
    """Faithful equivalent of RNN.forward: one step, one pallas_call.

    Launch-overhead-bound at small B; for the closed-loop AIR case batch as
    many parallel samples as possible per call.
    """
    B = x.shape[0]
    B_pad = _round_up(B, _SUBLANE)

    x_flat = _pad_batch(x.reshape(B, -1).astype(jnp.float32), B_pad)
    z = _pad_batch(z_im1.astype(jnp.float32), B_pad)
    h = _pad_batch(h_im1.astype(jnp.float32), B_pad)

    flat_wb = _flat_weight_list(params)
    num_hidden_layers = len(params["hidden_ws"]) + 1
    d_out_pad = params["w_out"].shape[1]

    args = [x_flat, z, h] + flat_wb
    in_specs = [pl.BlockSpec(a.shape, lambda: (0, 0)) for a in args]

    out = pl.pallas_call(
        _make_step_kernel(num_hidden_layers),
        out_shape=jax.ShapeDtypeStruct((B_pad, d_out_pad), jnp.float32),
        in_specs=in_specs,
        out_specs=pl.BlockSpec((B_pad, d_out_pad), lambda: (0, 0)),
    )(*args)

    out = out[:B]
    omega_i = out[:, :output_size]
    h_i = out[:, output_size:output_size + hidden_state_dim]
    if not baseline_net:
        omega_i = omega_i.at[:, 0].set(jax.nn.sigmoid(omega_i[:, 0]))
    return omega_i, h_i


@functools.partial(jax.jit,
                   static_argnames=("output_size", "hidden_state_dim", "baseline_net"))
def rnn_rollout(x, z_seq, h_0, params, *, output_size, hidden_state_dim,
                baseline_net):
    """T recurrent applications of RNN.forward fused into one pallas_call.

    x: (B, C, H, W) (same image every step), z_seq: (T, B, d_z), h_0: (B, d_h).
    Returns (omega_seq (T, B, output_size), h_seq (T, B, d_h)).
    # TODO(synk): in the full AIR model z_{i-1} depends on the previous step's
    # omega through other networks; that closed loop cannot be fused here, so
    # this entry point covers the precomputed-z / baseline case.
    """
    T, B = z_seq.shape[0], x.shape[0]
    d_z = z_seq.shape[2]
    d_h = hidden_state_dim
    d_out_pad = params["w_out"].shape[1]
    z_lo = output_size + d_h                 # z slot inside the 128-lane layout
    assert z_lo + d_z <= d_out_pad

    # batch padding / tiling: 128-row tiles on a "parallel" axis when B is
    # large (uses v7x's second TensorCore); a single tile otherwise.
    if B <= _LANE:
        B_pad = _round_up(B, _SUBLANE)
        btile = B_pad
    else:
        B_pad = _round_up(B, _LANE)
        btile = _LANE
    n_btiles = B_pad // btile

    x_flat = _pad_batch(x.reshape(B, -1).astype(jnp.float32), B_pad)
    d_x = x_flat.shape[1]

    # z pre-placed in its reserved lanes of the 128-wide carried layout
    z_pad = jnp.zeros((T, B_pad, d_out_pad), jnp.float32)
    z_pad = z_pad.at[:, :B, z_lo:z_lo + d_z].set(z_seq.astype(jnp.float32))

    # initial carry: h_0 placed at its lanes, everything else zero
    h_init = jnp.zeros((B_pad, d_out_pad), jnp.float32)
    h_init = h_init.at[:B, output_size:output_size + d_h].set(h_0.astype(jnp.float32))

    # biases pre-broadcast to btile rows (no broadcast inside the unrolled loop)
    b0_b = jnp.broadcast_to(params["b0"], (btile, params["b0"].shape[1]))
    hidden_bs_b = [jnp.broadcast_to(b, (btile, b.shape[1]))
                   for b in params["hidden_bs"]]
    b_out_b = jnp.broadcast_to(params["b_out"], (btile, d_out_pad))

    flat_wb = [params["w0x"], params["w0zh"], b0_b]
    for w, bb in zip(params["hidden_ws"], hidden_bs_b):
        flat_wb += [w, bb]
    flat_wb += [params["w_out"], b_out_b]

    num_hidden_layers = len(params["hidden_ws"]) + 1

    in_specs = (
        [pl.BlockSpec((btile, d_x), lambda b: (b, 0)),                 # x tile
         pl.BlockSpec((T, btile, d_out_pad), lambda b: (0, b, 0)),     # all z, resident
         pl.BlockSpec((btile, d_out_pad), lambda b: (b, 0))]           # initial carry
        + [pl.BlockSpec(a.shape, lambda b: (0, 0)) for a in flat_wb]   # weights resident
    )

    out_seq = pl.pallas_call(
        _make_rollout_kernel(num_hidden_layers, T),
        out_shape=jax.ShapeDtypeStruct((T, B_pad, d_out_pad), jnp.float32),
        grid=(n_btiles,),
        in_specs=in_specs,
        out_specs=pl.BlockSpec((T, btile, d_out_pad), lambda b: (0, b, 0)),
        compiler_params=pltpu.CompilerParams(
            dimension_semantics=("parallel",),   # independent batch tiles
        ),
    )(x_flat, z_pad, h_init, *flat_wb)

    out_seq = out_seq[:, :B]
    omega_seq = out_seq[:, :, :output_size]
    h_seq = out_seq[:, :, output_size:output_size + d_h]
    if not baseline_net:
        omega_seq = omega_seq.at[:, :, 0].set(jax.nn.sigmoid(omega_seq[:, :, 0]))
    return omega_seq, h_seq


# ----------------------------------------------------------------------------
# Deterministic parameter init (mirrors nn.Linear default + output overrides)
# ----------------------------------------------------------------------------
def init_params(key, layer_dims, output_size, output_bias_init):
    weights, biases = [], []
    for i in range(len(layer_dims) - 1):
        fan_in, fan_out = layer_dims[i], layer_dims[i + 1]
        key, k_w, k_b = jax.random.split(key, 3)
        bound = 1.0 / np.sqrt(fan_in)
        weights.append(jax.random.uniform(k_w, (fan_in, fan_out), jnp.float32, -bound, bound))
        biases.append(jax.random.uniform(k_b, (1, fan_out), jnp.float32, -bound, bound))
    # output layer overrides: omega weight cols <- 0, omega bias <- init
    weights[-1] = weights[-1].at[:, :output_size].set(0.0)
    biases[-1] = biases[-1].at[0, :output_size].set(
        jnp.asarray(output_bias_init, jnp.float32))
    return weights, biases


# ----------------------------------------------------------------------------
# Pure-JAX references (mirror the module with the same bf16-MXU precision)
# ----------------------------------------------------------------------------
def rnn_forward_ref(x, z_im1, h_im1, weights, biases, output_size, baseline_net,
                    compute_dtype=jnp.bfloat16):
    B = x.shape[0]
    act = jnp.concatenate([x.reshape(B, -1), z_im1, h_im1], axis=1).astype(jnp.float32)
    for w, b in zip(weights[:-1], biases[:-1]):
        y = jnp.dot(act.astype(compute_dtype), w.astype(compute_dtype),
                    preferred_element_type=jnp.float32) + b
        act = jnp.maximum(y, 0.0)
    out = jnp.dot(act.astype(compute_dtype), weights[-1].astype(compute_dtype),
                  preferred_element_type=jnp.float32) + biases[-1]
    omega = out[:, :output_size]
    h = out[:, output_size:]
    if not baseline_net:
        omega = omega.at[:, 0].set(jax.nn.sigmoid(omega[:, 0]))
    return omega, h


def rnn_rollout_ref(x, z_seq, h_0, weights, biases, output_size, baseline_net,
                    compute_dtype=jnp.bfloat16):
    h = h_0
    omegas, hs = [], []
    for t in range(z_seq.shape[0]):
        omega, h = rnn_forward_ref(x, z_seq[t], h, weights, biases,
                                   output_size, baseline_net, compute_dtype)
        omegas.append(omega)
        hs.append(h)
    return jnp.stack(omegas), jnp.stack(hs)


if __name__ == "__main__":
    config = dict(
        img_channels=1,
        img_dim=16,
        hidden_state_dim=32,
        latent_space_dim=8,
        FC_hidden_dims=[64, 64],
        output_size=7,
        output_bias_init=[2.0, 0.0, 0.0, 0.0, 0.0, 0.0, 0.0],
        baseline_net=False,
    )
    d_x = config["img_dim"] ** 2 * config["img_channels"]
    d_z = config["latent_space_dim"]
    d_h = config["hidden_state_dim"]
    input_size = d_x + d_h + d_z
    layer_dims = ([input_size] + config["FC_hidden_dims"]
                  + [config["output_size"] + d_h])

    key = jax.random.PRNGKey(0)
    key, k_p, k_x, k_z, k_h, k_zs = jax.random.split(key, 6)
    weights, biases = init_params(k_p, layer_dims, config["output_size"],
                                  config["output_bias_init"])
    params = prepare_params(weights, biases, d_x, d_z, d_h,
                            config["output_size"])

    B, T = 2, 8
    x = jax.random.normal(
        k_x, (B, config["img_channels"], config["img_dim"], config["img_dim"]),
        jnp.float32)
    z_im1 = jax.random.normal(k_z, (B, d_z), jnp.float32)
    h_im1 = jax.random.normal(k_h, (B, d_h), jnp.float32)
    z_seq = jax.random.normal(k_zs, (T, B, d_z), jnp.float32)

    # --- single step (module forward semantics) ---
    omega_i, h_i = rnn_forward(x, z_im1, h_im1, params,
                               output_size=config["output_size"],
                               hidden_state_dim=d_h,
                               baseline_net=config["baseline_net"])
    jax.block_until_ready((omega_i, h_i))
    omega_r, h_r = rnn_forward_ref(x, z_im1, h_im1, weights, biases,
                                   config["output_size"], config["baseline_net"])
    np.testing.assert_allclose(np.asarray(omega_i), np.asarray(omega_r),
                               rtol=5e-3, atol=5e-3)
    np.testing.assert_allclose(np.asarray(h_i), np.asarray(h_r),
                               rtol=5e-3, atol=5e-3)

    # --- fused T-step rollout (one pallas_call, in-kernel unrolled recurrence) ---
    omega_seq, h_seq = rnn_rollout(x, z_seq, h_im1, params,
                                   output_size=config["output_size"],
                                   hidden_state_dim=d_h,
                                   baseline_net=config["baseline_net"])
    jax.block_until_ready((omega_seq, h_seq))
    omega_sr, h_sr = rnn_rollout_ref(x, z_seq, h_im1, weights, biases,
                                     config["output_size"],
                                     config["baseline_net"])
    np.testing.assert_allclose(np.asarray(omega_seq), np.asarray(omega_sr),
                               rtol=5e-3, atol=5e-3)
    np.testing.assert_allclose(np.asarray(h_seq), np.asarray(h_sr),
                               rtol=5e-3, atol=5e-3)

    print("KERNEL_OK")
</pallas_src>

<mosaic_0001>
module attributes {stable_mosaic.version = 11 : i64} {
  func.func @kernel(%arg0: memref<8x256xf32, #tpu.memory_space<vmem>>, %arg1: memref<8x8xf32, #tpu.memory_space<vmem>>, %arg2: memref<8x32xf32, #tpu.memory_space<vmem>>, %arg3: memref<256x64xbf16, #tpu.memory_space<vmem>>, %arg4: memref<8x64xbf16, #tpu.memory_space<vmem>>, %arg5: memref<32x64xbf16, #tpu.memory_space<vmem>>, %arg6: memref<1x64xf32, #tpu.memory_space<vmem>>, %arg7: memref<64x64xbf16, #tpu.memory_space<vmem>>, %arg8: memref<1x64xf32, #tpu.memory_space<vmem>>, %arg9: memref<64x128xbf16, #tpu.memory_space<vmem>>, %arg10: memref<1x128xf32, #tpu.memory_space<vmem>>, %arg11: memref<8x128xf32, #tpu.memory_space<vmem>>) attributes {dimension_semantics = [], scalar_prefetch = 0 : i64, scratch_operands = 0 : i64, tpu.core_type = #tpu.core_type<tc>} {
    %c0 = arith.constant 0 : index
    %c0_0 = arith.constant 0 : index
    %0 = vector.load %arg0[%c0, %c0_0] : memref<8x256xf32, #tpu.memory_space<vmem>>, vector<8x256xf32>
    %1 = arith.truncf %0 : vector<8x256xf32> to vector<8x256xbf16>
    %c0_1 = arith.constant 0 : index
    %c0_2 = arith.constant 0 : index
    %2 = vector.load %arg3[%c0_1, %c0_2] : memref<256x64xbf16, #tpu.memory_space<vmem>>, vector<256x64xbf16>
    %cst = arith.constant dense<0.000000e+00> : vector<8x64xf32>
    %3 = tpu.matmul %1, %2, %cst {dimension_numbers = #tpu.dot_dimension_numbers<[1], [0], [0], [1], [0, 0, 1, 1], [], []>} : vector<8x256xbf16>, vector<256x64xbf16>, vector<8x64xf32> -> vector<8x64xf32>
    %c0_3 = arith.constant 0 : index
    %c0_4 = arith.constant 0 : index
    %4 = vector.load %arg1[%c0_3, %c0_4] : memref<8x8xf32, #tpu.memory_space<vmem>>, vector<8x8xf32>
    %5 = arith.truncf %4 : vector<8x8xf32> to vector<8x8xbf16>
    %c0_5 = arith.constant 0 : index
    %c0_6 = arith.constant 0 : index
    %6 = vector.load %arg4[%c0_5, %c0_6] : memref<8x64xbf16, #tpu.memory_space<vmem>>, vector<8x64xbf16>
    %cst_7 = arith.constant dense<0.000000e+00> : vector<8x64xf32>
    %7 = tpu.matmul %5, %6, %cst_7 {dimension_numbers = #tpu.dot_dimension_numbers<[1], [0], [0], [1], [0, 0, 1, 1], [], []>} : vector<8x8xbf16>, vector<8x64xbf16>, vector<8x64xf32> -> vector<8x64xf32>
    %8 = arith.addf %3, %7 : vector<8x64xf32>
    %c0_8 = arith.constant 0 : index
    %c0_9 = arith.constant 0 : index
    %9 = vector.load %arg2[%c0_8, %c0_9] : memref<8x32xf32, #tpu.memory_space<vmem>>, vector<8x32xf32>
    %10 = arith.truncf %9 : vector<8x32xf32> to vector<8x32xbf16>
    %c0_10 = arith.constant 0 : index
    %c0_11 = arith.constant 0 : index
    %11 = vector.load %arg5[%c0_10, %c0_11] : memref<32x64xbf16, #tpu.memory_space<vmem>>, vector<32x64xbf16>
    %cst_12 = arith.constant dense<0.000000e+00> : vector<8x64xf32>
    %12 = tpu.matmul %10, %11, %cst_12 {dimension_numbers = #tpu.dot_dimension_numbers<[1], [0], [0], [1], [0, 0, 1, 1], [], []>} : vector<8x32xbf16>, vector<32x64xbf16>, vector<8x64xf32> -> vector<8x64xf32>
    %13 = arith.addf %8, %12 : vector<8x64xf32>
    %c0_13 = arith.constant 0 : index
    %c0_14 = arith.constant 0 : index
    %14 = vector.load %arg6[%c0_13, %c0_14] : memref<1x64xf32, #tpu.memory_space<vmem>>, vector<1x64xf32>
    %15 = vector.broadcast %14 : vector<1x64xf32> to vector<8x64xf32>
    %16 = arith.addf %13, %15 : vector<8x64xf32>
    %cst_15 = arith.constant 0.000000e+00 : f32
    %17 = vector.broadcast %cst_15 : f32 to vector<8x64xf32>
    %18 = arith.maximumf %16, %17 : vector<8x64xf32>
    %19 = arith.truncf %18 : vector<8x64xf32> to vector<8x64xbf16>
    %c0_16 = arith.constant 0 : index
    %c0_17 = arith.constant 0 : index
    %20 = vector.load %arg7[%c0_16, %c0_17] : memref<64x64xbf16, #tpu.memory_space<vmem>>, vector<64x64xbf16>
    %cst_18 = arith.constant dense<0.000000e+00> : vector<8x64xf32>
    %21 = tpu.matmul %19, %20, %cst_18 {dimension_numbers = #tpu.dot_dimension_numbers<[1], [0], [0], [1], [0, 0, 1, 1], [], []>} : vector<8x64xbf16>, vector<64x64xbf16>, vector<8x64xf32> -> vector<8x64xf32>
    %c0_19 = arith.constant 0 : index
    %c0_20 = arith.constant 0 : index
    %22 = vector.load %arg8[%c0_19, %c0_20] : memref<1x64xf32, #tpu.memory_space<vmem>>, vector<1x64xf32>
    %23 = vector.broadcast %22 : vector<1x64xf32> to vector<8x64xf32>
    %24 = arith.addf %21, %23 : vector<8x64xf32>
    %cst_21 = arith.constant 0.000000e+00 : f32
    %25 = vector.broadcast %cst_21 : f32 to vector<8x64xf32>
    %26 = arith.maximumf %24, %25 : vector<8x64xf32>
    %27 = arith.truncf %26 : vector<8x64xf32> to vector<8x64xbf16>
    %c0_22 = arith.constant 0 : index
    %c0_23 = arith.constant 0 : index
    %28 = vector.load %arg9[%c0_22, %c0_23] : memref<64x128xbf16, #tpu.memory_space<vmem>>, vector<64x128xbf16>
    %cst_24 = arith.constant dense<0.000000e+00> : vector<8x128xf32>
    %29 = tpu.matmul %27, %28, %cst_24 {dimension_numbers = #tpu.dot_dimension_numbers<[1], [0], [0], [1], [0, 0, 1, 1], [], []>} : vector<8x64xbf16>, vector<64x128xbf16>, vector<8x128xf32> -> vector<8x128xf32>
    %c0_25 = arith.constant 0 : index
    %c0_26 = arith.constant 0 : index
    %30 = vector.load %arg10[%c0_25, %c0_26] : memref<1x128xf32, #tpu.memory_space<vmem>>, vector<1x128xf32>
    %31 = vector.broadcast %30 : vector<1x128xf32> to vector<8x128xf32>
    %32 = arith.addf %29, %31 : vector<8x128xf32>
    %c0_27 = arith.constant 0 : index
    %c0_28 = arith.constant 0 : index
    %33 = vector.load %arg11[%c0_27, %c0_28] : memref<8x128xf32, #tpu.memory_space<vmem>>, vector<8x128xf32>
    tpu.vector_store %arg11[%c0_27, %c0_28], %32 {strides = array<i32>} : memref<8x128xf32, #tpu.memory_space<vmem>>, vector<8x128xf32>,
    return
  }
}

</mosaic_0001>

<bundles_post_ra>
// kernel: rnn_forward.1
= control target key start
LH: loop header
LB: loop body
LE: loop exit
PB: predicated region body
PF: predicated region fallthrough
CT: control target
= control target key end

     0   :  { %vm82_vm0 = vcmask 1043456   ;;  %v643_v0 = vmov 0.0   ;;  %vm644_vm1 = vmmov 0   ;;  %vm78_vm2 = vcmask 64512   ;;  %s831_s4 = inlined_call_operand.vmem [shape: bf16[8,64], index: 4, kind: input, shape index: {}]   ;;  %s832_s1 = inlined_call_operand.vmem [shape: f32[8,8], index: 1, kind: input, shape index: {}]   ;;  %s833_s3 = inlined_call_operand.vmem [shape: bf16[256,64], index: 3, kind: input, shape index: {}]   ;;  %s834_s5 = inlined_call_operand.vmem [shape: bf16[32,64], index: 5, kind: input, shape index: {}]   ;;  %s835_s0 = inlined_call_operand.vmem [shape: f32[8,256], index: 0, kind: input, shape index: {}]   ;;  %s836_s2 = inlined_call_operand.vmem [shape: f32[8,32], index: 2, kind: input, shape index: {}]   ;;  %s837_s7 = inlined_call_operand.vmem [shape: bf16[64,64], index: 7, kind: input, shape index: {}]   ;;  %s838_s9 = inlined_call_operand.vmem [shape: bf16[64,128], index: 9, kind: input, shape index: {}]   ;;  %s839_s6 = inlined_call_operand.vmem [shape: f32[1,64], index: 6, kind: input, shape index: {}]   ;;  %s840_s8 = inlined_call_operand.vmem [shape: f32[1,64], index: 8, kind: input, shape index: {}]   ;;  %s841_s10 = inlined_call_operand.vmem [shape: f32[1,128], index: 10, kind: input, shape index: {}]   ;;  %s842_s11 = inlined_call_operand.vmem [shape: f32[8,128], index: 11, kind: output, shape index: {}]  }
   0x1   :  { %577 = vmatprep.subr.bf16.mxu1 %v643_v0  ;;  %v77_v1 = vld [vmem:[%s831_s4] sm:$0xf]  ;;  %579 = vmatprep.mubr.msk.bf16.mxu1 %vm644_vm1, %v643_v0  ;;  %v619_v7 = vld [vmem:[%s833_s3 + $0x48] sm:$0xff]   ;;  %v621_v9 = vld [vmem:[%s833_s3 + $0x50] sm:$0xff]   ;;  %vm280_vm3 = vcmask 261120   ;;  %vm374_vm4 = vcmask 523264  }
   0x2   :  { %v75_v2 = vld [vmem:[%s832_s1] sm:$0xff]  ;;  %v84_v3 = vsel %vm82_vm0, %v77_v1, 0  ;;  %583 = vmatprep.subr.bf16.mxu0 %v643_v0  ;;  %587 = vmatprep.mubr.msk.bf16.mxu0 %vm644_vm1, %v643_v0  ;;  %v620_v8 = vld [vmem:[%s833_s3 + $0x8] sm:$0xff]   ;;  %v622_v10 = vld [vmem:[%s833_s3 + $0x10] sm:$0xff]  }
   0x3   :  { %v76_v4 = vpack.c.bf16 %v75_v2, %v75_v2  ;;  %v617_v5 = vld [vmem:[%s833_s3 + $0x40] sm:$0xff]   ;;  %578 = vmatpush3.bf16.msra.mxu1 %v84_v3  ;;  %v623_v11 = vld [vmem:[%s833_s3 + $0x58] sm:$0xff]   ;;  %v40_v16 = vld [vmem:[%s835_s0 + $0x8] sm:$0xff] }
   0x4   :  { %v618_v6 = vld [vmem:[%s833_s3] sm:$0xff]   ;;  %542 = vmatprep.subr.bf16.mxu1 %v617_v5  ;;  %v624_v12 = vld [vmem:[%s833_s3 + $0x18] sm:$0xff]   ;;  %v627_v17 = vld [vmem:[%s833_s3 + $0x68] sm:$0xff]   ;;  %v42_v18 = vpack.c.bf16 %v40_v16, %v40_v16 }
   0x5   :  { %v625_v13 = vld [vmem:[%s833_s3 + $0x60] sm:$0xff]   ;;  %v634_v19 = vld [vmem:[%s834_s5 + $0x8] sm:$0xff]   ;;  %v629_v23 = vld [vmem:[%s833_s3 + $0x70] sm:$0xff]  }
   0x6   :  { %580 = vmatmul.mubr.msk.bf16.vlgmr.msra.gmra.mrb[0].mxu1 %vm78_vm2, %v76_v4  ;;  %v631_v14 = vld [vmem:[%s834_s5] sm:$0xff]   ;;  %v628_v22 = vld [vmem:[%s833_s3 + $0x28] sm:$0xff]   ;;  %v630_v24 = vld [vmem:[%s833_s3 + $0x30] sm:$0xff]  }
   0x7   :  { %543 = vmatpush3.bf16.msra.mxu1 %v618_v6  ;;  %v626_v15 = vld [vmem:[%s833_s3 + $0x20] sm:$0xff]   ;;  %584 = vmatpush3.bf16.msra.mxu0 %v631_v14  ;;  %v632_v25 = vld [vmem:[%s833_s3 + $0x78] sm:$0xff]   ;;  %v636_v30 = vld [vmem:[%s837_s7 + $0x8] sm:$0xff]  }
   0x8   :  { %544 = vmatprep.subr.bf16.mxu1 %v619_v7  ;;  %585 = vmatprep.subr.bf16.mxu0 %v643_v0  ;;  %v262_v20 = vld [vmem:[%s836_s2] sm:$0xff]  ;;  %v633_v26 = vld [vmem:[%s833_s3 + $0x38] sm:$0xff]   ;;  %v637_v31 = vld [vmem:[%s837_s7 + $0x10] sm:$0xff]  }
   0x9   :  { %v263_v21 = vpack.c.bf16 %v262_v20, %v262_v20  ;;  %254 = vmatprep.mubr.bf16.mxu1 %v42_v18  ;;  %v39_v27 = vld [vmem:[%s835_s0] sm:$0xff]  ;;  %v638_v32 = vld [vmem:[%s837_s7 + $0x18] sm:$0xff]   ;;  %v640_v53 = vld [vmem:[%s838_s9 + $0x8] sm:$0xff]  }
   0xa   :  { %v41_v28 = vpack.c.bf16 %v39_v27, %v39_v27  ;;  %v635_v29 = vld [vmem:[%s837_s7] sm:$0xff]   ;;  %v641_v54 = vld [vmem:[%s838_s9 + $0x10] sm:$0xff]   ;;  %v642_v55 = vld [vmem:[%s838_s9 + $0x18] sm:$0xff]  }
   0xb   :  { %545 = vmatpush3.bf16.msra.mxu1 %v620_v8  ;;  %586 = vmatpush3.bf16.msra.mxu0 %v634_v19  ;;  %v527_v47 = vld [vmem:[%s839_s6] ss:$0 sm:$0xff] }
   0xc   :  { %546 = vmatprep.subr.bf16.mxu1 %v621_v9  ;;  %591 = vmatprep.subr.bf16.mxu0 %v643_v0  ;;  %v639_v51 = vld [vmem:[%s838_s9] sm:$0xff]  }
   0xd   :  { %v528_v56 = vld [vmem:[%s840_s8] ss:$0 sm:$0xff] }
   0xe   :  { %588 = vmatmul.mubr.msk.bf16.vlgmr.msra.gmra.mrb[0].mxu0 %vm280_vm3, %v263_v21 }
   0xf   :  { %547 = vmatpush3.bf16.msra.mxu1 %v622_v10  ;;  %599 = vmatprep.mubr.msk.bf16.mxu0 %vm644_vm1, %v643_v0 }
  0x10   :  { %548 = vmatprep.subr.bf16.mxu1 %v623_v11  ;;  %592 = vmatpush3.bf16.msra.mxu0 %v635_v29 }
  0x11   :  { %593 = vmatprep.subr.bf16.mxu0 %v643_v0 }
  0x13   :  { %549 = vmatpush3.bf16.msra.mxu1 %v624_v12 }
  0x14   :  { %550 = vmatprep.subr.bf16.mxu1 %v625_v13  ;;  %594 = vmatpush3.bf16.msra.mxu0 %v636_v30 }
  0x15   :  { %595 = vmatprep.subr.bf16.mxu0 %v643_v0 }
  0x17   :  { %551 = vmatpush3.bf16.msra.mxu1 %v626_v15 }
  0x18   :  { %552 = vmatprep.subr.bf16.mxu1 %v627_v17  ;;  %596 = vmatpush3.bf16.msra.mxu0 %v637_v31 }
  0x19   :  { %597 = vmatprep.subr.bf16.mxu0 %v643_v0 }
  0x1b   :  { %553 = vmatpush3.bf16.msra.mxu1 %v628_v22 }
  0x1c   :  { %554 = vmatprep.subr.bf16.mxu1 %v629_v23  ;;  %598 = vmatpush3.bf16.msra.mxu0 %v638_v32 }
  0x1d   :  { %603 = vmatprep.subr.bf16.mxu0 %v643_v0 }
  0x1f   :  { %555 = vmatpush3.bf16.msra.mxu1 %v630_v24 }
  0x20   :  { %556 = vmatprep.subr.bf16.mxu1 %v632_v25 }
  0x23   :  { %557 = vmatpush3.bf16.msra.mxu1 %v633_v26 }
  0x26   :  { %255 = vmatmul.mubr.bf16.vlgmr.msra.gmra.mrb[4].mxu1 %v41_v28 }
  0xd9   :  { %v120_v33 = vpop.f32.mrb[0].mxu1 }
  0xda   :  { %v581_v34 = vpop.f32.mrb[1].mxu1 }
  0xdb   :  { %v123_v35 = vpop.f32.mrb[2].mxu1 }
  0xdc   :  { %v582_v36 = vpop.f32.mrb[3].mxu1 }
  0xe1   :  { %v318_v37 = vpop.f32.mrb[0].mxu0 }
  0xe2   :  { %v589_v38 = vpop.f32.mrb[1].mxu0 }
  0xe3   :  { %v321_v39 = vpop.f32.mrb[2].mxu0 }
  0xe4   :  { %v590_v40 = vpop.f32.mrb[3].mxu0 }
  0xf9   :  { %v558_v41 = vpop.f32.mrb[4].mxu1 }
  0xfa   :  { %v559_v42 = vpop.f32.mrb[5].mxu1 }
  0xfb   :  { %v560_v43 = vadd.f32 %v559_v42, %v558_v41  ;;  %v561_v44 = vpop.f32.mrb[6].mxu1 }
  0xfc   :  { %v562_v45 = vpop.f32.mrb[7].mxu1 }
  0xfd   :  { %v257_v46 = vadd.f32 %v560_v43, %v120_v33 }
  0xff   :  { %v324_v48 = vadd.f32 %v318_v37, %v257_v46 }
 0x101   :  { %v332_v49 = vadd.f32 %v527_v47, %v324_v48 }
 0x103   :  { %v333_v50 = vmax.f32 %v332_v49, 0.0 }
 0x105   :  { %v334_v52 = vpack.c.bf16 %v333_v50, %v333_v50 }
 0x107   :  { %600 = vmatmul.mubr.msk.bf16.vlgmr.msra.gmra.mrb[4].mxu0 %vm374_vm4, %v334_v52 }
 0x108   :  { %604 = vmatpush3.bf16.msra.mxu0 %v639_v51  ;;  %611 = vmatprep.mubr.msk.bf16.mxu0 %vm644_vm1, %v643_v0 }
 0x109   :  { %605 = vmatprep.subr.bf16.mxu0 %v643_v0 }
 0x10c   :  { %606 = vmatpush3.bf16.msra.mxu0 %v640_v53 }
 0x10d   :  { %607 = vmatprep.subr.bf16.mxu0 %v643_v0 }
 0x110   :  { %608 = vmatpush3.bf16.msra.mxu0 %v641_v54 }
 0x111   :  { %609 = vmatprep.subr.bf16.mxu0 %v643_v0  ;;  %v534_v0 = vld [vmem:[%s841_s10] ss:$0 sm:$0xff] }
 0x114   :  { %610 = vmatpush3.bf16.msra.mxu0 %v642_v55 }
 0x1da   :  { %v412_v57 = vpop.f32.mrb[4].mxu0 }
 0x1db   :  { %v413_v58 = vadd.f32 %v528_v56, %v412_v57  ;;  %v601_v59 = vpop.f32.mrb[5].mxu0 }
 0x1dc   :  { %v415_v60 = vpop.f32.mrb[6].mxu0 }
 0x1dd   :  { %v418_v61 = vmax.f32 %v413_v58, 0.0  ;;  %v602_v62 = vpop.f32.mrb[7].mxu0 }
 0x1df   :  { %v419_v63 = vpack.c.bf16 %v418_v61, %v418_v61 }
 0x1e1   :  { %612 = vmatmul.mubr.msk.bf16.vlgmr.msra.gmra.mrb[8].mxu0 %vm374_vm4, %v419_v63 }
 0x2b4   :  { %v496_v1 = vpop.f32.mrb[8].mxu0 }
 0x2b5   :  { %v497_v2 = vadd.f32 %v534_v0, %v496_v1  ;;  %v613_v3 = vpop.f32.mrb[9].mxu0 }
 0x2b6   :  { %v499_v4 = vpop.f32.mrb[10].mxu0 }
 0x2b7   :  { %502 = vst [vmem:[%s842_s11] sm:$0xff] %v497_v2  ;;  %v614_v5 = vpop.f32.mrb[11].mxu0 }

</bundles_post_ra>
